<compile_context>
chip_gen: v7x
topology: tpu7x:2x2x1
jax: 0.10.0
libtpu: 0.0.40
codegen_flags: <defaults>
</compile_context>

<pallas_src>
import jax
import jax.numpy as jnp
from jax import lax
from jax.experimental import pallas as pl
from jax.experimental.pallas import tpu as pltpu


def _pos_update_kernel(emb_ref, pos_ref, r_ref, ei_ref, w_ref, b_ref,
                       pos_out_ref, r_out_ref, shift_sc):
    # emb_ref : [D, n]     pos_ref : [dim, n]   r_ref  : [dim, e_t]
    # ei_ref  : [2, e_t]   w_ref   : [dim, D]   b_ref  : [dim, 1]
    # shift_sc: [dim, n]   (VMEM scratch, persists across edge tiles)

    # --- compute shift^T and new_pos^T only once (first edge tile) ---------
    @pl.when(pl.program_id(0) == 0)
    def _():
        emb = emb_ref[...]
        # Softplus (numerically stable, matches torch.nn.Softplus default).
        sp = jnp.maximum(emb, 0.0) + jnp.log1p(jnp.exp(-jnp.abs(emb)))
        # shift^T = W^T @ softplus(emb)^T + b   -> [dim, n] (lane-dense in n).
        shift = jnp.dot(w_ref[...], sp, preferred_element_type=jnp.float32)
        shift = shift + b_ref[...]                       # broadcast [dim, 1]
        shift_sc[...] = shift
        # pos output block is resident across the edge-tile axis; write once.
        pos_out_ref[...] = pos_ref[...] + shift

    shift = shift_sc[...]                                # [dim, n]

    # --- fused signed one-hot gather: one MXU matmul per edge tile ---------
    # shift[dst] - shift[src]  ==  shift^T @ (onehot(dst) - onehot(src))
    # (For very large n this would become a scalar-prefetch / pl.Element
    #  index-map gather; at GNN-sized graphs the dense one-hot per edge tile
    #  stays well inside VMEM.)
    n = emb_ref.shape[1]
    e_t = r_ref.shape[1]
    src = ei_ref[0:1, :]                                      # [1, e_t] int32
    dst = ei_ref[1:2, :]                                      # [1, e_t] int32
    node_iota = lax.broadcasted_iota(jnp.int32, (n, e_t), 0)  # [n, e_t]
    onehot_delta = ((node_iota == dst).astype(jnp.float32)
                    - (node_iota == src).astype(jnp.float32))  # [n, e_t]
    delta = jnp.dot(shift, onehot_delta,
                    preferred_element_type=jnp.float32)        # [dim, e_t]
    r_out_ref[...] = r_ref[...] + delta


def pos_update(edge_index, pos, r, node_embedding, w, b, *, max_e_tile=512):
    """edge_index: [2, e] int, pos: [n, dim], r: [e, dim],
    node_embedding: [n, D], w: [D, dim], b: [dim] -> (new_pos, new_r)."""
    n, d = node_embedding.shape
    e = r.shape[0]
    dim = pos.shape[1]

    # Layout plumbing only (no compute): transpose to lane-dense layout.
    emb_t = node_embedding.astype(jnp.float32).T        # [D, n]
    pos_t = pos.astype(jnp.float32).T                   # [dim, n]
    r_t = r.astype(jnp.float32).T                       # [dim, e]
    ei = edge_index.astype(jnp.int32)                   # [2, e] (row0=src, row1=dst)
    w_t = w.astype(jnp.float32).T                       # [dim, D]
    b2 = b.astype(jnp.float32).reshape(dim, 1)          # [dim, 1]

    # Edge-axis tile: full extent when small, otherwise a multiple of 128.
    e_tile = e if e <= max_e_tile else max_e_tile
    grid = (pl.cdiv(e, e_tile),)

    def resident(shape):
        return pl.BlockSpec(shape, lambda i: (0,) * len(shape))

    def edge_blk(rows):
        return pl.BlockSpec((rows, e_tile), lambda i: (0, i))

    pos_out_t, r_out_t = pl.pallas_call(
        _pos_update_kernel,
        grid=grid,
        in_specs=[
            resident((d, n)),        # node_embedding^T (loaded once, resident)
            resident((dim, n)),      # pos^T
            edge_blk(dim),           # r^T          (tiled over edges)
            edge_blk(2),             # edge_index   (tiled over edges)
            resident((dim, d)),      # W^T
            resident((dim, 1)),      # b
        ],
        out_specs=[
            resident((dim, n)),      # new_pos^T (resident across edge tiles)
            edge_blk(dim),           # new_r^T
        ],
        out_shape=[
            jax.ShapeDtypeStruct((dim, n), jnp.float32),
            jax.ShapeDtypeStruct((dim, e), jnp.float32),
        ],
        scratch_shapes=[pltpu.VMEM((dim, n), jnp.float32)],  # cached shift^T
        # pos^T -> new_pos^T, r^T -> new_r^T (pure additive updates, in-place).
        input_output_aliases={1: 0, 2: 1},
        compiler_params=pltpu.CompilerParams(
            dimension_semantics=("arbitrary",),
            vmem_limit_bytes=32 * 1024 * 1024),
    )(emb_t, pos_t, r_t, ei, w_t, b2)

    # Back to the module's [index, feature] layout.
    return pos_out_t.T, r_out_t.T


def _reference(edge_index, pos, r, node_embedding, w, b):
    sp = jax.nn.softplus(node_embedding)
    shift = sp @ w + b
    new_pos = pos + shift
    new_r = r + shift[edge_index[1]] - shift[edge_index[0]]
    return new_pos, new_r


def _run_case(key, n, e, node_in, dim, max_e_tile):
    k1, k2, k3, k4, k5, k6, k7 = jax.random.split(key, 7)
    node_embedding = jax.random.normal(k1, (n, node_in), dtype=jnp.float32)
    pos = jax.random.normal(k2, (n, dim), dtype=jnp.float32)
    r = jax.random.normal(k3, (e, dim), dtype=jnp.float32)
    edge_index = jnp.stack([
        jax.random.randint(k4, (e,), 0, n, dtype=jnp.int32),
        jax.random.randint(k5, (e,), 0, n, dtype=jnp.int32),
    ], axis=0)                                              # [2, e]

    # Deterministic synthetic parameters for Linear(node_in, 2).
    w = jax.random.normal(k6, (node_in, dim), dtype=jnp.float32) * (1.0 / node_in ** 0.5)
    b = jax.random.normal(k7, (dim,), dtype=jnp.float32) * 0.1

    new_pos, new_r = pos_update(edge_index, pos, r, node_embedding, w, b,
                                max_e_tile=max_e_tile)
    jax.block_until_ready((new_pos, new_r))

    ref_pos, ref_r = _reference(edge_index, pos, r, node_embedding, w, b)
    assert jnp.allclose(new_pos, ref_pos, atol=1e-5, rtol=1e-5)
    assert jnp.allclose(new_r, ref_r, atol=1e-5, rtol=1e-5)


if __name__ == "__main__":
    key = jax.random.PRNGKey(0)
    k_a, k_b = jax.random.split(key)

    # Small case (single edge tile), matches the module's typical small shapes.
    _run_case(k_a, n=8, e=16, node_in=32, dim=2, max_e_tile=512)
    # Multi-tile case: exercises the edge-axis grid and resident pos output.
    _run_case(k_b, n=16, e=384, node_in=32, dim=2, max_e_tile=128)

    print("KERNEL_OK")
</pallas_src>

<mosaic_0001>
module attributes {stable_mosaic.version = 11 : i64} {
  func.func @_pos_update_kernel(%arg0: i32, %arg1: memref<32x8xf32, #tpu.memory_space<vmem>>, %arg2: memref<2x8xf32, #tpu.memory_space<vmem>>, %arg3: memref<2x16xf32, #tpu.memory_space<vmem>>, %arg4: memref<2x16xi32, #tpu.memory_space<vmem>>, %arg5: memref<2x32xf32, #tpu.memory_space<vmem>>, %arg6: memref<2x1xf32, #tpu.memory_space<vmem>>, %arg7: memref<2x8xf32, #tpu.memory_space<vmem>>, %arg8: memref<2x16xf32, #tpu.memory_space<vmem>>, %arg9: memref<2x8xf32, #tpu.memory_space<vmem>>) attributes {dimension_semantics = [#tpu.dimension_semantics<arbitrary>], iteration_bounds = array<i64: 1>, scalar_prefetch = 0 : i64, scratch_operands = 1 : i64, tpu.core_type = #tpu.core_type<tc>, window_params = [{pipeline_mode = #tpu.pipeline_mode<synchronous>, transform_indices = @transform_0, window_bounds = array<i64: 32, 8>}, {pipeline_mode = #tpu.pipeline_mode<synchronous>, transform_indices = @transform_1, window_bounds = array<i64: 2, 8>}, {transform_indices = @transform_2, window_bounds = array<i64: 2, 16>}, {transform_indices = @transform_3, window_bounds = array<i64: 2, 16>}, {pipeline_mode = #tpu.pipeline_mode<synchronous>, transform_indices = @transform_4, window_bounds = array<i64: 2, 32>}, {pipeline_mode = #tpu.pipeline_mode<synchronous>, transform_indices = @transform_5, window_bounds = array<i64: 2, 1>}, {pipeline_mode = #tpu.pipeline_mode<synchronous>, transform_indices = @transform_6, window_bounds = array<i64: 2, 8>}, {transform_indices = @transform_7, window_bounds = array<i64: 2, 16>}]} {
    %c0_i32 = arith.constant 0 : i32
    %0 = arith.cmpi eq, %arg0, %c0_i32 : i32
    %1 = arith.extui %0 : i1 to i32
    %c0_i32_0 = arith.constant 0 : i32
    %2 = arith.cmpi ne, %1, %c0_i32_0 : i32
    scf.if %2 {
      %c0_9 = arith.constant 0 : index
      %c0_10 = arith.constant 0 : index
      %20 = vector.load %arg1[%c0_9, %c0_10] : memref<32x8xf32, #tpu.memory_space<vmem>>, vector<32x8xf32>
      %cst_11 = arith.constant 0.000000e+00 : f32
      %21 = vector.broadcast %cst_11 : f32 to vector<32x8xf32>
      %22 = arith.maximumf %20, %21 : vector<32x8xf32>
      %23 = math.absf %20 : vector<32x8xf32>
      %cst_12 = arith.constant 0.000000e+00 : f32
      %24 = vector.broadcast %cst_12 : f32 to vector<32x8xf32>
      %25 = arith.subf %24, %23 : vector<32x8xf32>
      %26 = math.exp %25 : vector<32x8xf32>
      %27 = math.log1p %26 : vector<32x8xf32>
      %28 = arith.addf %22, %27 : vector<32x8xf32>
      %c0_13 = arith.constant 0 : index
      %c0_14 = arith.constant 0 : index
      %29 = vector.load %arg5[%c0_13, %c0_14] : memref<2x32xf32, #tpu.memory_space<vmem>>, vector<2x32xf32>
      %cst_15 = arith.constant dense<0.000000e+00> : vector<2x8xf32>
      %30 = tpu.matmul %29, %28, %cst_15 {dimension_numbers = #tpu.dot_dimension_numbers<[1], [0], [0], [1], [0, 0, 1, 1], [], []>} : vector<2x32xf32>, vector<32x8xf32>, vector<2x8xf32> -> vector<2x8xf32>
      %c0_16 = arith.constant 0 : index
      %c0_17 = arith.constant 0 : index
      %31 = vector.load %arg6[%c0_16, %c0_17] : memref<2x1xf32, #tpu.memory_space<vmem>>, vector<2x1xf32>
      %32 = vector.broadcast %31 : vector<2x1xf32> to vector<2x8xf32>
      %33 = arith.addf %30, %32 : vector<2x8xf32>
      %c0_18 = arith.constant 0 : index
      %c0_19 = arith.constant 0 : index
      %34 = vector.load %arg9[%c0_18, %c0_19] : memref<2x8xf32, #tpu.memory_space<vmem>>, vector<2x8xf32>
      tpu.vector_store %arg9[%c0_18, %c0_19], %33 {strides = array<i32>} : memref<2x8xf32, #tpu.memory_space<vmem>>, vector<2x8xf32>,
      %c0_20 = arith.constant 0 : index
      %c0_21 = arith.constant 0 : index
      %35 = vector.load %arg2[%c0_20, %c0_21] : memref<2x8xf32, #tpu.memory_space<vmem>>, vector<2x8xf32>
      %36 = arith.addf %35, %33 : vector<2x8xf32>
      %c0_22 = arith.constant 0 : index
      %c0_23 = arith.constant 0 : index
      %37 = vector.load %arg7[%c0_22, %c0_23] : memref<2x8xf32, #tpu.memory_space<vmem>>, vector<2x8xf32>
      tpu.vector_store %arg7[%c0_22, %c0_23], %36 {strides = array<i32>} : memref<2x8xf32, #tpu.memory_space<vmem>>, vector<2x8xf32>,
    } else {
    }
    %c0 = arith.constant 0 : index
    %c0_1 = arith.constant 0 : index
    %3 = vector.load %arg9[%c0, %c0_1] : memref<2x8xf32, #tpu.memory_space<vmem>>, vector<2x8xf32>
    %c0_2 = arith.constant 0 : index
    %c0_3 = arith.constant 0 : index
    %4 = vector.load %arg4[%c0_2, %c0_3] : memref<2x16xi32, #tpu.memory_space<vmem>>, vector<1x16xi32>
    %c1 = arith.constant 1 : index
    %c0_4 = arith.constant 0 : index
    %5 = vector.load %arg4[%c1, %c0_4] : memref<2x16xi32, #tpu.memory_space<vmem>>, vector<1x16xi32>
    %6 = tpu.iota {dimensions = array<i32: 0>} : vector<8x16xi32>
    %7 = vector.broadcast %5 : vector<1x16xi32> to vector<8x16xi32>
    %8 = arith.cmpi eq, %6, %7 : vector<8x16xi32>
    %9 = arith.extui %8 : vector<8x16xi1> to vector<8x16xi32>
    %10 = arith.sitofp %9 : vector<8x16xi32> to vector<8x16xf32>
    %11 = vector.broadcast %4 : vector<1x16xi32> to vector<8x16xi32>
    %12 = arith.cmpi eq, %6, %11 : vector<8x16xi32>
    %13 = arith.extui %12 : vector<8x16xi1> to vector<8x16xi32>
    %14 = arith.sitofp %13 : vector<8x16xi32> to vector<8x16xf32>
    %15 = arith.subf %10, %14 : vector<8x16xf32>
    %cst = arith.constant dense<0.000000e+00> : vector<2x16xf32>
    %16 = tpu.matmul %3, %15, %cst {dimension_numbers = #tpu.dot_dimension_numbers<[1], [0], [0], [1], [0, 0, 1, 1], [], []>} : vector<2x8xf32>, vector<8x16xf32>, vector<2x16xf32> -> vector<2x16xf32>
    %c0_5 = arith.constant 0 : index
    %c0_6 = arith.constant 0 : index
    %17 = vector.load %arg3[%c0_5, %c0_6] : memref<2x16xf32, #tpu.memory_space<vmem>>, vector<2x16xf32>
    %18 = arith.addf %17, %16 : vector<2x16xf32>
    %c0_7 = arith.constant 0 : index
    %c0_8 = arith.constant 0 : index
    %19 = vector.load %arg8[%c0_7, %c0_8] : memref<2x16xf32, #tpu.memory_space<vmem>>, vector<2x16xf32>
    tpu.vector_store %arg8[%c0_7, %c0_8], %18 {strides = array<i32>} : memref<2x16xf32, #tpu.memory_space<vmem>>, vector<2x16xf32>,
    return
  }
  func.func @transform_0(%arg0: i32) -> (i32, i32) {
    %c0_i32 = arith.constant 0 : i32
    %c0_i32_0 = arith.constant 0 : i32
    %c0_i32_1 = arith.constant 0 : i32
    return %c0_i32, %c0_i32_0 : i32, i32
  }
  func.func @transform_1(%arg0: i32) -> (i32, i32) {
    %c0_i32 = arith.constant 0 : i32
    %c0_i32_0 = arith.constant 0 : i32
    %c0_i32_1 = arith.constant 0 : i32
    return %c0_i32, %c0_i32_0 : i32, i32
  }
  func.func @transform_2(%arg0: i32) -> (i32, i32) {
    %c0_i32 = arith.constant 0 : i32
    %c0_i32_0 = arith.constant 0 : i32
    return %c0_i32, %arg0 : i32, i32
  }
  func.func @transform_3(%arg0: i32) -> (i32, i32) {
    %c0_i32 = arith.constant 0 : i32
    %c0_i32_0 = arith.constant 0 : i32
    return %c0_i32, %arg0 : i32, i32
  }
  func.func @transform_4(%arg0: i32) -> (i32, i32) {
    %c0_i32 = arith.constant 0 : i32
    %c0_i32_0 = arith.constant 0 : i32
    %c0_i32_1 = arith.constant 0 : i32
    return %c0_i32, %c0_i32_0 : i32, i32
  }
  func.func @transform_5(%arg0: i32) -> (i32, i32) {
    %c0_i32 = arith.constant 0 : i32
    %c0_i32_0 = arith.constant 0 : i32
    %c0_i32_1 = arith.constant 0 : i32
    return %c0_i32, %c0_i32_0 : i32, i32
  }
  func.func @transform_6(%arg0: i32) -> (i32, i32) {
    %c0_i32 = arith.constant 0 : i32
    %c0_i32_0 = arith.constant 0 : i32
    %c0_i32_1 = arith.constant 0 : i32
    return %c0_i32, %c0_i32_0 : i32, i32
  }
  func.func @transform_7(%arg0: i32) -> (i32, i32) {
    %c0_i32 = arith.constant 0 : i32
    %c0_i32_0 = arith.constant 0 : i32
    return %c0_i32, %arg0 : i32, i32
  }
}

</mosaic_0001>

<bundles_post_ra>
// kernel: tpu_custom_call.1
= control target key start
LH: loop header
LB: loop body
LE: loop exit
PB: predicated region body
PF: predicated region fallthrough
CT: control target
= control target key end

     0   :  { %13 = vsyncpa [#allocation4], 0  ;;  %s638_s0 = inlined_call_operand.vmem [shape: f32[32,8], index: 0, kind: input, shape index: {}]   ;;  %s639_s1 = inlined_call_operand.hbm [shape: f32[2,8], index: 1, kind: input, shape index: {}, may-alias: {1,6}]   ;;  %s640_s2 = inlined_call_operand.hbm [shape: f32[2,16], index: 2, kind: input, shape index: {}, may-alias: {2,7}]   ;;  %s641_s3 = inlined_call_operand.vmem [shape: s32[2,16], index: 3, kind: input, shape index: {}]   ;;  %s642_s4 = inlined_call_operand.vmem [shape: f32[2,32], index: 4, kind: input, shape index: {}]   ;;  %s643_s5 = inlined_call_operand.vmem [shape: f32[2,1], index: 5, kind: input, shape index: {}]   ;;  %s644_s6 = inlined_call_operand.hbm [shape: f32[2,8], index: 6, kind: output, shape index: {0}, may-alias: {1,6}]   ;;  %s645_s7 = inlined_call_operand.hbm [shape: f32[2,16], index: 7, kind: output, shape index: {1}, may-alias: {2,7}]  }
   0x1   :  { %14 = vsyncpa [#allocation7], 0 }
   0x2   :  { %15 = vsyncpa [#allocation5], 0 }
   0x3   :  { %16 = vsyncpa [#allocation10], 0  ;;  %s489_s24 = smov [#allocation3]   ;;  %s490_s26 = smov [#allocation6]  }
   0x4   :  { %s25_s25 = sshll.u32 %s489_s24, 4  ;;  %s35_s27 = sshll.u32 %s490_s26, 4  ;;  %s26_s25 = int_to_ptr.vmem [resolvable:$true] %s25_s25  ;;  %s36_s27 = int_to_ptr.vmem [resolvable:$true] %s35_s27 }
   0x5   :  { %s393_s30 = scalar_lea.hbm %s639_s1, 32 }
   0x6   :  { %p394_p0 = scmp.ne.s32.totalorder %s639_s1, %s393_s30  ;;  %p397_p1 = scmp.lt.u32.totalorder %s393_s30, %s639_s1 }
   0x8   :  { %p399_p2 = pnand %p397_p1, %p394_p0 }
   0xa   :  { %402 = shalt.err (!%p399_p2)
}
   0xb   :  { %s403_s12 = scalar_lea.vmem %s26_s25, 32  ;;  %p408_p4 = scmp.lt.s32.totalorder %s26_s25, %s26_s25 }
   0xc   :  { %p404_p3 = scmp.ne.s32.totalorder %s26_s25, %s403_s12  ;;  %p409_p5 = scmp.lt.s32.totalorder %s403_s12, %s403_s12 }
   0xe   :  { %p410_p6 = por %p409_p5, %p408_p4 }
  0x10   :  { %p411_p7 = pnand %p410_p6, %p404_p3 }
  0x12   :  { %414 = shalt.err (!%p411_p7)
}
  0x13   :  { %28 = dma.hbm_to_vmem [thread:$0]  %s639_s1, 32, %s26_s25, [#allocation4]  }
  0x14   :  { %s415_s17 = scalar_lea.hbm %s640_s2, 32 }
  0x15   :  { %p416_p8 = scmp.ne.s32.totalorder %s640_s2, %s415_s17  ;;  %p419_p9 = scmp.lt.u32.totalorder %s415_s17, %s640_s2 }
  0x17   :  { %p421_p10 = pnand %p419_p9, %p416_p8 }
  0x19   :  { %424 = shalt.err (!%p421_p10)
}
  0x1a   :  { %s425_s22 = scalar_lea.vmem %s36_s27, 32  ;;  %p430_p12 = scmp.lt.s32.totalorder %s36_s27, %s36_s27 }
  0x1b   :  { %p426_p11 = scmp.ne.s32.totalorder %s36_s27, %s425_s22  ;;  %p431_p13 = scmp.lt.s32.totalorder %s425_s22, %s425_s22 }
  0x1d   :  { %p432_p0 = por %p431_p13, %p430_p12 }
  0x1f   :  { %p433_p1 = pnand %p432_p0, %p426_p11 }
  0x21   :  { %436 = shalt.err (!%p433_p1)
}
  0x22   :  { %38 = dma.hbm_to_vmem [thread:$0]  %s640_s2, 32, %s36_s27, [#allocation7]  }
  0x23   :  { %481 = dma.done.wait [#allocation4], 32  }
  0x24   :  { %482 = vsyncadd [#allocation4], 4294967264 }
  0x25   :  { %483 = dma.done.wait [#allocation7], 32  }
  0x26   :  { %484 = vsyncadd [#allocation7], 4294967264  ;;  %v491_v0 = vmov 0.0|0.0   ;;  %vm492_vm0 = vmmov 0   ;;  %v493_v1 = vmov 0.0   ;;  %v494_v2 = vmov 0  }
  0x27   :  { %362 = vmatprep.subr.bf16.mxu0 %v491_v0  ;;  %354 = vmatprep.mubr.msk.f32.mxu0 %vm492_vm0, %v493_v1  ;;  %v568_v3 = vld [vmem:[%s638_s0] sm:$0xff]  ;;  %v573_v4 = vld [vmem:[%s638_s0 + $0x8] sm:$0xff]  ;;  %v578_v5 = vld [vmem:[%s638_s0 + $0x10] sm:$0xff]  ;;  %vm126_vm5 = vcmask 261120   ;;  %vm200_vm8 = vcmask 58368   ;;  %vm225_vm9 = vcmask 64512  }
  0x28   :  { %376 = vset.pattern.permute.xlu0 %v494_v2  ;;  %357 = vmatprep.subr.mxu1 %v493_v1  ;;  %v63_v6 = vand.u32 2147483647, %v568_v3  ;;  %v64_v7 = vand.u32 2147483647, %v573_v4  ;;  %v585_v8 = vld [vmem:[%s638_s0 + $0x18] sm:$0xff]  ;;  %v59_v41 = vmax.f32 %v568_v3, 0.0 }
  0x29   :  { %359 = vmatprep.mubr.msk.f32.mxu1 %vm492_vm0, %v493_v1  ;;  %v65_v9 = vand.u32 2147483647, %v578_v5  ;;  %v66_v12 = vand.u32 2147483647, %v585_v8  ;;  %v120_v14 = vld [vmem:[%s643_s5] sm:$0x3] }
  0x2a   :  { %v67_v10 = vsub.f32 0.0, %v63_v6  ;;  %v68_v11 = vsub.f32 0.0, %v64_v7  ;;  %123 = vperm.xlu0 %376, %v120_v14   ;;  %v60_v46 = vmax.f32 %v573_v4, 0.0  ;;  %v61_v51 = vmax.f32 %v578_v5, 0.0  ;;  %v119_v5 = vld [vmem:[%s642_s4] sm:$0x3] }
  0x2b   :  { %v69_v13 = vsub.f32 0.0, %v65_v9  ;;  %v70_v17 = vsub.f32 0.0, %v66_v12  ;;  %v62_v58 = vmax.f32 %v585_v8, 0.0  ;;  %v208_v6 = vlaneseq  ;;  %v336_v8 = vld [vmem:[%s641_s3] ss:$0 sm:$0xff] }
  0x2c   :  { %v71_v15 = vmul.f32 1.442695, %v67_v10  ;;  %v73_v16 = vmul.f32 1.442695, %v68_v11  ;;  %v334_v9 = vld [vmem:[%s641_s3 + $0x1] ss:$0 sm:$0xff] }
  0x2d   :  { %v75_v18 = vmul.f32 1.442695, %v69_v13  ;;  %v77_v19 = vmul.f32 1.442695, %v70_v17  ;;  %v209_v7 = vshrl.u32 %v208_v6, 7  ;;  %s495_s3 = smov [#allocation8]  }
  0x2e   :  { %377 = vpow2.f32 %v71_v15  ;;  %v202_v14 = vld [vmem:[#allocation3] sm:$0x3]  ;;  %s309_s4 = sshll.u32 %s495_s3, 4  ;;  %s310_s4 = int_to_ptr.vmem [resolvable:$true] %s309_s4 }
  0x2f   :  { %379 = vpow2.f32 %v73_v16  ;;  %vm214_vm6 = vcmp.eq.s32.totalorder %v209_v7, %v334_v9  ;;  %vm221_vm7 = vcmp.eq.s32.totalorder %v209_v7, %v336_v8  ;;  %s437_s14 = scalar_lea.vmem %s310_s4, 32  ;;  %p442_p3 = scmp.lt.s32.totalorder %s310_s4, %s310_s4 }
  0x30   :  { %381 = vpow2.f32 %v75_v18  ;;  %v337_v10 = vsel %vm221_vm7, 1.0, %v493_v1  ;;  %p438_p2 = scmp.ne.s32.totalorder %s310_s4, %s437_s14  ;;  %p443_p4 = scmp.lt.s32.totalorder %s437_s14, %s437_s14 }
  0x31   :  { %383 = vpow2.f32 %v77_v19 }
  0x32   :  { %p444_p5 = por %p443_p4, %p442_p3 }
  0x34   :  { %p445_p6 = pnand %p444_p5, %p438_p2 }
  0x38   :  { %v378_v20 = vpop.eup %377 }
  0x39   :  { %v380_v21 = vpop.eup %379  ;;  %v79_v22 = vadd.f32 1.0, %v378_v20  ;;  %v82_v27 = vmul.f32 -0.5, %v378_v20  ;;  %v85_v33 = vand.u32 2147483647, %v378_v20 }
  0x3a   :  { %v382_v23 = vpop.eup %381  ;;  %v88_v24 = vadd.f32 1.0, %v380_v21  ;;  %v91_v28 = vmul.f32 -0.5, %v380_v21  ;;  %v94_v35 = vand.u32 2147483647, %v380_v21 }
  0x3b   :  { %v384_v25 = vpop.eup %383  ;;  %385 = vlog2.f32 %v79_v22  ;;  %v97_v26 = vadd.f32 1.0, %v382_v23  ;;  %v100_v30 = vmul.f32 -0.5, %v382_v23  ;;  %v83_v31 = vadd.f32 1.0, %v82_v27 }
  0x3c   :  { %387 = vlog2.f32 %v88_v24  ;;  %v106_v29 = vadd.f32 1.0, %v384_v25  ;;  %v109_v32 = vmul.f32 -0.5, %v384_v25  ;;  %v92_v34 = vadd.f32 1.0, %v91_v28 }
  0x3d   :  { %389 = vlog2.f32 %v97_v26  ;;  %v101_v36 = vadd.f32 1.0, %v100_v30  ;;  %v103_v37 = vand.u32 2147483647, %v382_v23  ;;  %v84_v38 = vmul.f32 %v378_v20, %v83_v31 }
  0x3e   :  { %391 = vlog2.f32 %v106_v29  ;;  %v110_v39 = vadd.f32 1.0, %v109_v32  ;;  %vm593_vm1 = vcmp.lt.f32.partialorder %v85_v33, 0.0004427343  ;;  %v93_v43 = vmul.f32 %v380_v21, %v92_v34 }
  0x3f   :  { %v112_v44 = vand.u32 2147483647, %v384_v25  ;;  %vm95_vm2 = vcmp.lt.f32.partialorder %v94_v35, 0.0004427343  ;;  %v102_v48 = vmul.f32 %v382_v23, %v101_v36  ;;  %vm104_vm3 = vcmp.lt.f32.partialorder %v103_v37, 0.0004427343 }
  0x40   :  { %v111_v54 = vmul.f32 %v384_v25, %v110_v39 }
  0x41   :  { %vm113_vm4 = vcmp.lt.f32.partialorder %v112_v44, 0.0004427343 }
  0x45   :  { %v386_v40 = vpop.eup %385 }
  0x46   :  { %v388_v45 = vpop.eup %387  ;;  %v81_v47 = vmul.f32 0.6931472, %v386_v40 }
  0x47   :  { %v390_v49 = vpop.eup %389  ;;  %v90_v50 = vmul.f32 0.6931472, %v388_v45 }
  0x48   :  { %v87_v52 = vsel %vm593_vm1, %v84_v38, %v81_v47  ;;  %v99_v53 = vmul.f32 0.6931472, %v390_v49  ;;  %v392_v55 = vpop.eup %391 }
  0x49   :  { %v96_v56 = vsel %vm95_vm2, %v93_v43, %v90_v50  ;;  %v115_v57 = vadd.f32 %v87_v52, %v59_v41  ;;  %v108_v61 = vmul.f32 0.6931472, %v392_v55 }
  0x4a   :  { %v116_v59 = vadd.f32 %v96_v56, %v60_v46  ;;  %v105_v60 = vsel %vm104_vm3, %v102_v48, %v99_v53 }
  0x4b   :  { %v117_v62 = vadd.f32 %v105_v60, %v61_v51  ;;  %v114_v2 = vsel %vm113_vm4, %v111_v54, %v108_v61 }
  0x4c   :  { %v363_v63 = vpack.c.bf16 %v116_v59, %v115_v57  ;;  %v118_v3 = vadd.f32 %v114_v2, %v62_v58 }
  0x4e   :  { %364 = vmatpush3.bf16.msra.mxu0 %v363_v63  ;;  %v366_v4 = vpack.c.bf16 %v118_v3, %v117_v62 }
  0x4f   :  { %365 = vmatprep.subr.bf16.mxu0 %v491_v0  ;;  %v335_v0 = vsel %vm214_vm6, 1.0, %v493_v1 }
  0x50   :  { %v224_v11 = vsub.f32 %v335_v0, %v337_v10 }
  0x52   :  { %367 = vmatpush3.bf16.msra.mxu0 %v366_v4  ;;  %358 = vmatpush3.msra.mxu1 %v224_v11 }
  0x55   :  { %355 = vmatmul.mubr.msk.f32.vlgmr.msra.gmra.mrb[0].mxu0 %vm126_vm5, %v119_v5 }
  0xa9   :  { %v124_v12 = vpop.permute.xlu0 %123 }
 0x128   :  { %v196_v13 = vpop.f32.mrb[0].mxu0 }
 0x129   :  { %v197_v15 = vadd.f32 %v196_v13, %v124_v12  ;;  %v356_v16 = vpop.f32.mrb[1].mxu0 }
 0x12b   :  { %201 = vst.msk [vmem:[#allocation2] sm:$0x3] %vm200_vm8, %v197_v15  ;;  %v203_v17 = vadd.f32 %v202_v14, %v197_v15 }
 0x12d   :  { %204 = vst.msk [vmem:[#allocation8] sm:$0x3] %vm200_vm8, %v203_v17 }
 0x132   :  { %v205_v18 = vld [vmem:[#allocation2] sm:$0x3] }
 0x133   :  { %360 = vmatmul.mubr.msk.f32.vlgmr.msra.gmra.mrb[0].mxu1 %vm225_vm9, %v205_v18 }
 0x134   :  { %448 = shalt.err (!%p445_p6)
}
 0x135   :  { %s449_s17 = scalar_lea.hbm %s644_s6, 32 }
 0x136   :  { %p450_p7 = scmp.ne.s32.totalorder %s644_s6, %s449_s17  ;;  %p453_p8 = scmp.lt.u32.totalorder %s449_s17, %s644_s6 }
 0x138   :  { %p455_p9 = pnand %p453_p8, %p450_p7 }
 0x13a   :  { %458 = shalt.err (!%p455_p9)
}
 0x13b   :  { %312 = dma.vmem_to_hbm [thread:$0]  %s310_s4, 32, %s644_s6, [#allocation5]   ;;  %v299_v1 = vld [vmem:[#allocation6] sm:$0x3]  ;;  %vm301_vm10 = vcmask 123904  }
 0x13c   :  { %s496_s23 = smov [#allocation9]  }
 0x13d   :  { %s319_s24 = sshll.u32 %s496_s23, 4  ;;  %s320_s24 = int_to_ptr.vmem [resolvable:$true] %s319_s24 }
 0x13e   :  { %s459_s25 = scalar_lea.vmem %s320_s24, 32  ;;  %p464_p11 = scmp.lt.s32.totalorder %s320_s24, %s320_s24 }
 0x13f   :  { %p460_p10 = scmp.ne.s32.totalorder %s320_s24, %s459_s25  ;;  %p465_p12 = scmp.lt.s32.totalorder %s459_s25, %s459_s25 }
 0x141   :  { %p466_p13 = por %p465_p12, %p464_p11 }
 0x143   :  { %p467_p0 = pnand %p466_p13, %p460_p10 }
 0x206   :  { %v295_v19 = vpop.f32.mrb[0].mxu1 }
 0x207   :  { %v300_v20 = vadd.f32 %v299_v1, %v295_v19  ;;  %v361_v21 = vpop.f32.mrb[1].mxu1 }
 0x209   :  { %302 = vst.msk [vmem:[#allocation9] sm:$0x3] %vm301_vm10, %v300_v20 }
 0x20a   :  { %470 = shalt.err (!%p467_p0)
}
 0x20b   :  { %s471_s6 = scalar_lea.hbm %s645_s7, 32 }
 0x20c   :  { %p472_p1 = scmp.ne.s32.totalorder %s645_s7, %s471_s6  ;;  %p475_p2 = scmp.lt.u32.totalorder %s471_s6, %s645_s7 }
 0x20e   :  { %p477_p3 = pnand %p475_p2, %p472_p1 }
 0x210   :  { %480 = shalt.err (!%p477_p3)
}
 0x211   :  { %322 = dma.vmem_to_hbm [thread:$0]  %s320_s24, 32, %s645_s7, [#allocation10]  }
 0x212   :  { %485 = dma.done.wait [#allocation5], 32  }
 0x213   :  { %486 = vsyncadd [#allocation5], 4294967264 }
 0x214   :  { %487 = dma.done.wait [#allocation10], 32  }
 0x215   :  { %488 = vsyncadd [#allocation10], 4294967264 }
 0x216   :  { %329 = vsyncpa [#allocation4], 1 }
 0x217   :  { %330 = vsyncpa [#allocation7], 1 }
 0x218   :  { %331 = vsyncpa [#allocation5], 1 }
 0x219   :  { %332 = vsyncpa [#allocation10], 1 }

</bundles_post_ra>
